<compile_context>
chip_gen: v5e
topology: v5e:2x2
jax: 0.10.0
libtpu: 0.0.40
codegen_flags: <defaults>
</compile_context>

<pallas_src>
import jax
import jax.numpy as jnp
from jax import lax
from jax.experimental import pallas as pl
from jax.experimental.pallas import tpu as pltpu


# ---------------------------------------------------------------------------
# pltpu.roll convention probe
# ---------------------------------------------------------------------------
_ROLL_SIGN_CACHE = []


def _roll_sign():
    """Returns s such that pltpu.roll(x, (s*d) % n, axis)[j] == x[(j + d) % n].

    Tiny one-off self-check so the in-kernel shift direction is pinned to the
    runtime's rotate convention.  Must run outside jit (it reads a concrete
    value); the result is cached.
    """
    if not _ROLL_SIGN_CACHE:
        def probe(x_ref, o_ref):
            o_ref[...] = pltpu.roll(x_ref[...], 1, 1)

        x = lax.broadcasted_iota(jnp.int32, (8, 128), 1)
        out = pl.pallas_call(
            probe, out_shape=jax.ShapeDtypeStruct((8, 128), jnp.int32))(x)
        first = int(jax.device_get(out)[0, 0])
        # np.roll convention (result[j] = x[j - shift])  -> first == 127
        # opposite convention (result[j] = x[j + shift]) -> first == 1
        _ROLL_SIGN_CACHE.append(1 if first == 1 else -1)
    return _ROLL_SIGN_CACHE[0]


# ---------------------------------------------------------------------------
# Fused bottleneck kernel (one image per grid step)
# ---------------------------------------------------------------------------
def _make_bottleneck_kernel(W, compute_dtype, shifts):
    cdt = compute_dtype

    def kernel(x_ref, w1_ref, b1_ref, w2_ref, b2_ref, w3_ref, b3_ref,
               m_ref, o_ref):
        x = x_ref[0]                                          # (Cin, HW)

        # ---- conv1 (1x1) + bn1 + relu -----------------------------------
        h1 = jnp.dot(w1_ref[...], x, preferred_element_type=jnp.float32)
        h1 = jnp.maximum(h1 + b1_ref[...], 0.0)               # (P, HW) f32

        # ---- conv2 (3x3, pad 1) + bn2 + relu: 9 shifted taps ------------
        acc = None
        for t in range(9):
            dy, dx = t // 3 - 1, t % 3 - 1
            delta = dy * W + dx
            if delta == 0:
                tap = h1
            else:
                rolled = pltpu.roll(h1, shifts[t], 1)         # XLU lane rotate
                tap = rolled * m_ref[t]                       # zero out-of-image taps
            d = jnp.dot(w2_ref[t], tap.astype(cdt),
                        preferred_element_type=jnp.float32)
            acc = d if acc is None else acc + d
        h2 = jnp.maximum(acc + b2_ref[...], 0.0)              # (P, HW) f32

        # ---- conv3 (1x1) + bn3 + residual + relu ------------------------
        h3 = jnp.dot(w3_ref[...], h2.astype(cdt),
                     preferred_element_type=jnp.float32)
        y = jnp.maximum(h3 + b3_ref[...] + x.astype(jnp.float32), 0.0)
        o_ref[0] = y.astype(o_ref.dtype)

    return kernel


# ---------------------------------------------------------------------------
# Wrapper
# ---------------------------------------------------------------------------
def _bn_fold(gamma, beta, mean, var, eps=1e-5):
    scale = gamma / jnp.sqrt(var + eps)
    shift = beta - mean * scale
    return scale, shift


def _conv2_tap_masks(H, W):
    """(9, 1, H*W) f32 masks: 1 where the (dy, dx) tap lands inside the image."""
    y = jnp.arange(H)[:, None]
    x = jnp.arange(W)[None, :]
    ms = []
    for ky in range(3):
        for kx in range(3):
            dy, dx = ky - 1, kx - 1
            m = ((y + dy >= 0) & (y + dy < H) & (x + dx >= 0) & (x + dx < W))
            ms.append(m.reshape(1, H * W))
    return jnp.stack(ms).astype(jnp.float32)


def bottleneck_forward(x, params, eps=1e-5, compute_dtype=jnp.float32):
    """x: (N, H, W, Cin) NHWC.  Inference-mode BN (running stats folded)."""
    N, H, W, Cin = x.shape
    P = params["w1"].shape[1]
    assert Cin == 2 * P, "stride=1 / downsample=None => inplanes == 2*planes"
    HW = H * W
    cdt = compute_dtype

    s1, b1 = _bn_fold(*params["bn1"], eps)
    s2, b2 = _bn_fold(*params["bn2"], eps)
    s3, b3 = _bn_fold(*params["bn3"], eps)

    # Fold BN scale into the conv weights (done once in the wrapper).
    w1f = (params["w1"].T * s1[:, None]).astype(cdt)                   # (P, Cin)
    w2f = (jnp.transpose(params["w2"], (0, 1, 3, 2)).reshape(9, P, P)
           * s2[None, :, None]).astype(cdt)                            # (9, Pout, Pin)
    w3f = (params["w3"].T * s3[:, None]).astype(cdt)                   # (Cin, P)
    b1c = b1.reshape(P, 1).astype(jnp.float32)
    b2c = b2.reshape(P, 1).astype(jnp.float32)
    b3c = b3.reshape(Cin, 1).astype(jnp.float32)
    masks = _conv2_tap_masks(H, W)

    # Channels-first, flattened-spatial layout: lane axis = H*W (lane dense).
    x_cf = jnp.transpose(x, (0, 3, 1, 2)).reshape(N, Cin, HW).astype(cdt)

    sign = _roll_sign()
    shifts = tuple((sign * ((ky - 1) * W + (kx - 1))) % HW
                   for ky in range(3) for kx in range(3))
    kernel = _make_bottleneck_kernel(W, cdt, shifts)

    out_cf = pl.pallas_call(
        kernel,
        out_shape=jax.ShapeDtypeStruct((N, Cin, HW), jnp.float32),
        grid_spec=pltpu.PrefetchScalarGridSpec(
            num_scalar_prefetch=0,
            grid=(N,),
            in_specs=[
                pl.BlockSpec((1, Cin, HW), lambda i: (i, 0, 0)),   # x (also residual)
                pl.BlockSpec((P, Cin), lambda i: (0, 0)),          # w1 (scale folded)
                pl.BlockSpec((P, 1), lambda i: (0, 0)),            # bn1 shift
                pl.BlockSpec((9, P, P), lambda i: (0, 0, 0)),      # w2 taps (scale folded)
                pl.BlockSpec((P, 1), lambda i: (0, 0)),            # bn2 shift
                pl.BlockSpec((Cin, P), lambda i: (0, 0)),          # w3 (scale folded)
                pl.BlockSpec((Cin, 1), lambda i: (0, 0)),          # bn3 shift
                pl.BlockSpec((9, 1, HW), lambda i: (0, 0, 0)),     # conv2 tap masks
            ],
            out_specs=pl.BlockSpec((1, Cin, HW), lambda i: (i, 0, 0)),
        ),
        compiler_params=pltpu.CompilerParams(
            dimension_semantics=("parallel",)),
    )(x_cf, w1f, b1c, w2f, b2c, w3f, b3c, masks)

    return out_cf.reshape(N, Cin, H, W).transpose(0, 2, 3, 1)


# ---------------------------------------------------------------------------
# Pure-JAX reference (for correctness check)
# ---------------------------------------------------------------------------
def reference_forward(x, params, eps=1e-5):
    def bn(y, stats):
        g, b, m, v = stats
        return (y - m) / jnp.sqrt(v + eps) * g + b

    o = jnp.einsum("nhwc,cp->nhwp", x, params["w1"],
                   precision=lax.Precision.HIGHEST)
    o = jax.nn.relu(bn(o, params["bn1"]))
    o = lax.conv_general_dilated(
        o, params["w2"], window_strides=(1, 1), padding="SAME",
        dimension_numbers=("NHWC", "HWIO", "NHWC"),
        precision=lax.Precision.HIGHEST)
    o = jax.nn.relu(bn(o, params["bn2"]))
    o = jnp.einsum("nhwc,cp->nhwp", o, params["w3"],
                   precision=lax.Precision.HIGHEST)
    o = bn(o, params["bn3"]) + x
    return jax.nn.relu(o)


# ---------------------------------------------------------------------------
if __name__ == "__main__":
    key = jax.random.PRNGKey(0)
    keys = jax.random.split(key, 10)

    N, H, W = 2, 16, 16
    planes = 4
    inplanes = planes * 2       # expansion=2, downsample=None

    x = jax.random.normal(keys[0], (N, H, W, inplanes), jnp.float32)

    def bn_params(kg, kb, c):
        gamma = 1.0 + 0.1 * jax.random.normal(kg, (c,), jnp.float32)
        beta = 0.1 * jax.random.normal(kb, (c,), jnp.float32)
        mean = 0.05 * jnp.arange(c, dtype=jnp.float32)
        var = 1.0 + 0.1 * jnp.arange(c, dtype=jnp.float32)
        return (gamma, beta, mean, var)

    params = {
        "w1": 0.1 * jax.random.normal(keys[1], (inplanes, planes), jnp.float32),
        "w2": 0.1 * jax.random.normal(keys[2], (3, 3, planes, planes), jnp.float32),
        "w3": 0.1 * jax.random.normal(keys[3], (planes, 2 * planes), jnp.float32),
        "bn1": bn_params(keys[4], keys[5], planes),
        "bn2": bn_params(keys[6], keys[7], planes),
        "bn3": bn_params(keys[8], keys[9], 2 * planes),
    }

    ref = reference_forward(x, params)

    # f32 compute path: strict check against the JAX reference.
    out = jax.block_until_ready(bottleneck_forward(x, params))
    assert out.shape == ref.shape == (N, H, W, inplanes)
    assert jnp.allclose(out, ref, atol=1e-3, rtol=1e-3), "f32 mismatch vs reference"

    # bf16 compute path (v6e/v7x MXU fast path, f32 accumulation): loose check.
    out_bf16 = jax.block_until_ready(
        bottleneck_forward(x, params, compute_dtype=jnp.bfloat16))
    assert jnp.allclose(out_bf16, ref, atol=3e-2, rtol=3e-2), \
        "bf16 mismatch vs reference"

    print("KERNEL_OK")
</pallas_src>

<mosaic_0001>
module attributes {stable_mosaic.version = 11 : i64} {
  func.func @probe(%arg0: memref<8x128xi32, #tpu.memory_space<vmem>>, %arg1: memref<8x128xi32, #tpu.memory_space<vmem>>) attributes {dimension_semantics = [], scalar_prefetch = 0 : i64, scratch_operands = 0 : i64, tpu.core_type = #tpu.core_type<tc>} {
    %c0 = arith.constant 0 : index
    %c0_0 = arith.constant 0 : index
    %0 = vector.load %arg0[%c0, %c0_0] : memref<8x128xi32, #tpu.memory_space<vmem>>, vector<8x128xi32>
    %c1_i32 = arith.constant 1 : i32
    %1 = tpu.dynamic_rotate %0 by %c1_i32 dim 1 : vector<8x128xi32>, i32 -> vector<8x128xi32>
    %c0_1 = arith.constant 0 : index
    %c0_2 = arith.constant 0 : index
    %2 = vector.load %arg1[%c0_1, %c0_2] : memref<8x128xi32, #tpu.memory_space<vmem>>, vector<8x128xi32>
    tpu.vector_store %arg1[%c0_1, %c0_2], %1 {strides = array<i32>} : memref<8x128xi32, #tpu.memory_space<vmem>>, vector<8x128xi32>,
    return
  }
}

</mosaic_0001>

<bundles_post_ra>
// kernel: tpu_custom_call.1
= control target key start
LH: loop header
LB: loop body
LE: loop exit
PB: predicated region body
PF: predicated region fallthrough
CT: control target
= control target key end

     0   :  { %6 = vsyncpa [#allocation3], 0  ;;  %s118_s0 = inlined_call_operand.hbm [shape: s32[8,128], index: 0, kind: input, shape index: {}]   ;;  %s119_s1 = inlined_call_operand.hbm [shape: s32[8,128], index: 1, kind: output, shape index: {}]  }
   0x1   :  { %7 = vsyncpa [#allocation4], 0  ;;  %s13_s8 = sshll.u32 %s118_s0, 4  ;;  %s99_s9 = smov [#allocation2]   ;;  %s14_s8 = int_to_ptr.hbm [resolvable:$true] %s13_s8 }
   0x2   :  { %s15_s10 = sshll.u32 %s99_s9, 4  ;;  %s16_s10 = int_to_ptr.vmem [resolvable:$true] %s15_s10 }
   0x3   :  { %18 = dma.hbm_to_vmem [thread:$0]  %s14_s8, 128, %s16_s10, [#allocation3]  }
   0x4   :  { %95 = dma.done.wait [#allocation3], 128  }
   0x5   :  { %96 = vsyncadd [#allocation3], 4294967168  ;;  %v23_v0 = vld [vmem:[#allocation2] sm:$0xff]  ;;  %s100_s11 = smov 1   ;;  %s101_s12 = smov [#allocation5]  }
   0x6   :  { %24 = vrot.lane.b32.xlu0 %v23_v0, %s100_s11  ;;  %s32_s13 = sshll.u32 %s101_s12, 4  ;;  %s34_s16 = sshll.u32 %s119_s1, 4  ;;  %s33_s13 = int_to_ptr.vmem [resolvable:$true] %s32_s13  ;;  %s35_s16 = int_to_ptr.hbm [resolvable:$true] %s34_s16 }
  0x78   :  { %v25_v1 = vpop.permute.xlu0 %24 }
  0x79   :  { %26 = vst [vmem:[#allocation5] sm:$0xff] %v25_v1 }
  0x7a   :  { %37 = dma.vmem_to_hbm [thread:$0]  %s33_s13, 128, %s35_s16, [#allocation4]  }
  0x7b   :  { %97 = dma.done.wait [#allocation4], 128  }
  0x7c   :  { %98 = vsyncadd [#allocation4], 4294967168 }
  0x7d   :  { %42 = vsyncpa [#allocation3], 1 }
  0x7e   :  { %43 = vsyncpa [#allocation4], 1 }

</bundles_post_ra>
